<compile_context>
chip_gen: v7x
topology: tpu7x:2x2x1
jax: 0.10.0
libtpu: 0.0.40
codegen_flags: <defaults>
</compile_context>

<pallas_src>
import math
import functools

import jax
import jax.numpy as jnp
from jax.experimental import pallas as pl
from jax.experimental.pallas import tpu as pltpu


# ----------------------------------------------------------------------------
# Shared math helpers
# ----------------------------------------------------------------------------
def _layer_norm(x, gamma, beta, eps=1e-5):
    mu = jnp.mean(x, axis=-1, keepdims=True)
    var = jnp.mean((x - mu) ** 2, axis=-1, keepdims=True)
    return (x - mu) * jax.lax.rsqrt(var + eps) * gamma + beta


# ----------------------------------------------------------------------------
# Fused Pallas kernel: all encoder layers, one batch block per grid step.
#   grid = (batch_blocks, num_layers); the output block (index constant over
#   the layer axis) acts as the resident activation buffer across layers.
# ----------------------------------------------------------------------------
def _fused_encoder_kernel(num_heads, matmul_dtype,
                          x_ref, mask_ref,
                          wqkv_ref, bqkv_ref, wo_ref, bo_ref, g1_ref, be1_ref,
                          w1_ref, b1_ref, w2_ref, b2_ref, g2_ref, be2_ref,
                          o_ref):
    layer = pl.program_id(1)

    # Load the embedded inputs into the resident activation buffer once.
    @pl.when(layer == 0)
    def _():
        o_ref[...] = x_ref[...]

    Bt, S, D = o_ref.shape
    H = num_heads
    hd = D // H
    mm = matmul_dtype                       # bf16 operands, f32 accumulation

    x2 = o_ref[...].reshape(Bt * S, D)      # f32 activations, flattened rows

    # --- self attention ------------------------------------------------------
    # in_proj weights pre-transposed to (D, 3D); 1/sqrt(hd) pre-folded into Q.
    qkv = jnp.dot(x2.astype(mm), wqkv_ref[0],
                  preferred_element_type=jnp.float32) + bqkv_ref[0]   # (Bt*S, 3D)
    qkv3 = qkv.reshape(Bt, S, 3 * D)

    add_mask = mask_ref[...]                # (Bt, 1, S) additive (0 / -1e30)

    # Heads: short static unroll; each iteration is a batch-block-batched
    # MXU contraction on the last dims (no kh.T materialised).
    ctx_heads = []
    for h in range(H):
        qh = qkv3[:, :, h * hd:(h + 1) * hd].astype(mm)
        kh = qkv3[:, :, D + h * hd:D + (h + 1) * hd].astype(mm)
        vh = qkv3[:, :, 2 * D + h * hd:2 * D + (h + 1) * hd].astype(mm)
        s = jnp.einsum("bqd,bkd->bqk", qh, kh,
                       preferred_element_type=jnp.float32) + add_mask  # (Bt, S, S)
        s = s - jnp.max(s, axis=-1, keepdims=True)
        p = jnp.exp(s)
        p = p * pl.reciprocal(jnp.sum(p, axis=-1, keepdims=True), approx=True)
        ctx_heads.append(jnp.einsum("bqk,bkd->bqd", p.astype(mm), vh,
                                    preferred_element_type=jnp.float32))
    ctx = jnp.concatenate(ctx_heads, axis=-1).reshape(Bt * S, D)

    attn = jnp.dot(ctx.astype(mm), wo_ref[0],
                   preferred_element_type=jnp.float32) + bo_ref[0]

    x2 = _layer_norm(x2 + attn, g1_ref[0], be1_ref[0])

    # --- feed-forward (ReLU) --------------------------------------------------
    h1 = jnp.maximum(
        jnp.dot(x2.astype(mm), w1_ref[0], preferred_element_type=jnp.float32)
        + b1_ref[0], 0.0)
    h2 = jnp.dot(h1.astype(mm), w2_ref[0],
                 preferred_element_type=jnp.float32) + b2_ref[0]

    x2 = _layer_norm(x2 + h2, g2_ref[0], be2_ref[0])

    o_ref[...] = x2.reshape(Bt, S, D)


def transformer_encoder_layers_pallas(x, add_mask, stacked, num_heads, block_b=None):
    """x: (B, S, D) f32, add_mask: (B, 1, S) f32 additive key mask.
    `stacked`: per-layer weights stacked on a leading L dim, pre-transposed."""
    B, S, D = x.shape
    L = stacked["wqkv_t"].shape[0]

    if block_b is None:
        # Amortise per-grid-step overhead.  On v7x prefer block_b = B // 2 so the
        # "parallel" batch axis has extent >= 2 and both TensorCores get work.
        block_b = min(B, 8)
        while B % block_b:
            block_b -= 1
    assert B % block_b == 0
    grid_b = B // block_b

    def act_spec():
        return pl.BlockSpec((block_b, S, D), lambda b, l: (b, 0, 0))

    def per_layer_spec(arr):
        nd = arr.ndim
        return pl.BlockSpec((1,) + arr.shape[1:],
                            lambda b, l, _nd=nd: (l,) + (0,) * (_nd - 1))

    weight_names = ["wqkv_t", "bqkv", "wo_t", "bo", "g1", "be1",
                    "w1_t", "b1", "w2_t", "b2", "g2", "be2"]
    weight_args = [stacked[n] for n in weight_names]

    return pl.pallas_call(
        functools.partial(_fused_encoder_kernel, num_heads, stacked["wqkv_t"].dtype),
        out_shape=jax.ShapeDtypeStruct((B, S, D), jnp.float32),
        grid=(grid_b, L),
        in_specs=[act_spec(),
                  pl.BlockSpec((block_b, 1, S), lambda b, l: (b, 0, 0))]
                 + [per_layer_spec(w) for w in weight_args],
        out_specs=act_spec(),
        compiler_params=pltpu.CompilerParams(
            dimension_semantics=("parallel", "arbitrary"),
            vmem_limit_bytes=32 * 1024 * 1024),
    )(x, add_mask, *weight_args)


# ----------------------------------------------------------------------------
# Model glue (embedding, positional encoding, parameter prep)
# ----------------------------------------------------------------------------
class Vocab:
    def __init__(self, size, pad_index=0):
        self._size = size
        self.pad_index = pad_index

    def __len__(self):
        return self._size

    def pad(self):
        return self.pad_index


def sinusoidal_pe(max_len, d_model):
    position = jnp.arange(max_len, dtype=jnp.float32)[:, None]
    div_term = jnp.exp(jnp.arange(0, d_model, 2, dtype=jnp.float32)
                       * (-math.log(10000.0) / d_model))
    pe = jnp.zeros((max_len, d_model), dtype=jnp.float32)
    pe = pe.at[:, 0::2].set(jnp.sin(position * div_term))
    pe = pe.at[:, 1::2].set(jnp.cos(position * div_term))
    return pe


def init_params(key, vocab_size, pad_idx, d_model, ffn_dim, num_layers):
    keys = jax.random.split(key, 1 + num_layers)
    emb = jax.random.normal(keys[0], (vocab_size, d_model), jnp.float32) * (d_model ** -0.5)
    emb = emb.at[pad_idx].set(0.0)

    layers = []
    for li in range(num_layers):
        lk = jax.random.split(keys[1 + li], 4)
        layers.append(dict(
            wqkv=jax.random.normal(lk[0], (3 * d_model, d_model), jnp.float32) * 0.1,
            bqkv=jnp.zeros((1, 3 * d_model), jnp.float32),
            wo=jax.random.normal(lk[1], (d_model, d_model), jnp.float32) * 0.1,
            bo=jnp.zeros((1, d_model), jnp.float32),
            g1=jnp.ones((1, d_model), jnp.float32),
            be1=jnp.zeros((1, d_model), jnp.float32),
            w1=jax.random.normal(lk[2], (ffn_dim, d_model), jnp.float32) * 0.1,
            b1=jnp.zeros((1, ffn_dim), jnp.float32),
            w2=jax.random.normal(lk[3], (d_model, ffn_dim), jnp.float32) * 0.1,
            b2=jnp.zeros((1, d_model), jnp.float32),
            g2=jnp.ones((1, d_model), jnp.float32),
            be2=jnp.zeros((1, d_model), jnp.float32),
        ))
    return emb, layers


def prep_layer_params(layers, num_heads, matmul_dtype=jnp.bfloat16):
    """Stack per-layer weights (leading L dim), pre-transpose for x @ W, fold
    the 1/sqrt(head_dim) attention scale into the Q rows of in_proj, and cast
    matmul weights to bf16 (biases / LayerNorm params stay f32)."""
    D = layers[0]["wqkv"].shape[1]
    hd = D // num_heads
    scale = 1.0 / math.sqrt(hd)

    def stack(name):
        return jnp.stack([p[name] for p in layers])

    wqkv = stack("wqkv")                                    # (L, 3D, D)
    bqkv = stack("bqkv")                                    # (L, 1, 3D)
    wqkv = wqkv.at[:, :D, :].multiply(scale)                # fold scale into Q
    bqkv = bqkv.at[:, :, :D].multiply(scale)

    return dict(
        wqkv_t=jnp.swapaxes(wqkv, 1, 2).astype(matmul_dtype),        # (L, D, 3D)
        bqkv=bqkv.astype(jnp.float32),
        wo_t=jnp.swapaxes(stack("wo"), 1, 2).astype(matmul_dtype),    # (L, D, D)
        bo=stack("bo"),
        g1=stack("g1"), be1=stack("be1"),
        w1_t=jnp.swapaxes(stack("w1"), 1, 2).astype(matmul_dtype),    # (L, D, F)
        b1=stack("b1"),
        w2_t=jnp.swapaxes(stack("w2"), 1, 2).astype(matmul_dtype),    # (L, F, D)
        b2=stack("b2"),
        g2=stack("g2"), be2=stack("be2"),
    )


@functools.partial(jax.jit,
                   static_argnames=("pad_idx", "d_model", "num_heads", "block_b"))
def transformer_encoder_forward(tokens, emb, stacked, pe, *,
                                pad_idx, d_model, num_heads, block_b=None):
    # token embedding * sqrt(d_model) + positional encoding (dropout = eval identity)
    x = jnp.take(emb, tokens, axis=0) * math.sqrt(d_model)            # (B, S, D)
    S = tokens.shape[1]
    x = x + pe[:S][None, :, :]

    pad_mask = tokens == pad_idx                                      # (B, S) bool
    # Unconditional additive mask (jit-safe; no tracer->bool).
    add_mask = jnp.where(pad_mask, -1e30, 0.0).astype(jnp.float32)[:, None, :]

    x = transformer_encoder_layers_pallas(x, add_mask, stacked, num_heads, block_b)
    return x, pad_mask


def transformer_encoder_apply(tokens, emb, stacked, pe, pad_idx, d_model, num_heads,
                              block_b=None):
    """Non-jitted wrapper that reproduces the module's `None`-mask convention."""
    x, pad_mask = transformer_encoder_forward(
        tokens, emb, stacked, pe,
        pad_idx=pad_idx, d_model=d_model, num_heads=num_heads, block_b=block_b)
    encoder_padding_mask = pad_mask if bool(jnp.any(pad_mask)) else None
    return x, encoder_padding_mask


# ----------------------------------------------------------------------------
# Pure-JAX f32 reference (PyTorch-equivalent math) for a sanity check.
# ----------------------------------------------------------------------------
def _ref_layer(x, add_mask, p, num_heads):
    D = x.shape[-1]
    hd = D // num_heads
    qkv = x @ p["wqkv"].T + p["bqkv"][0]
    q, k, v = qkv[..., :D], qkv[..., D:2 * D], qkv[..., 2 * D:]
    outs = []
    for h in range(num_heads):
        qh, kh, vh = (t[..., h * hd:(h + 1) * hd] for t in (q, k, v))
        s = jnp.einsum("bqd,bkd->bqk", qh, kh) / math.sqrt(hd) + add_mask
        pattn = jax.nn.softmax(s, axis=-1)
        outs.append(jnp.einsum("bqk,bkd->bqd", pattn, vh))
    attn = jnp.concatenate(outs, -1) @ p["wo"].T + p["bo"][0]
    x = _layer_norm(x + attn, p["g1"][0], p["be1"][0])
    h1 = jnp.maximum(x @ p["w1"].T + p["b1"][0], 0.0)
    x = _layer_norm(x + h1 @ p["w2"].T + p["b2"][0], p["g2"][0], p["be2"][0])
    return x


if __name__ == "__main__":
    # Small shapes consistent with TransformerEncoder.build defaults.
    B, S = 2, 8
    d_model, ffn_dim, num_layers, num_heads = 16, 32, 2, 2
    vocab = Vocab(size=20, pad_index=0)

    key = jax.random.PRNGKey(0)
    k_tok, k_par = jax.random.split(key)

    # Tokens in [1, V); pad out the tail of sequence 1 to exercise the mask.
    tokens = jax.random.randint(k_tok, (B, S), 1, len(vocab), dtype=jnp.int32)
    tokens = tokens.at[1, 5:].set(vocab.pad())

    emb, layer_params = init_params(k_par, len(vocab), vocab.pad(),
                                    d_model, ffn_dim, num_layers)
    pe = sinusoidal_pe(5000, d_model)
    stacked = prep_layer_params(layer_params, num_heads)   # bf16, pre-transposed

    out, pad_mask = transformer_encoder_apply(
        tokens, emb, stacked, pe, vocab.pad_index, d_model, num_heads)
    out = jax.block_until_ready(out)

    # Sanity check against a pure-f32 JAX reference of the same math.
    # (Kernel uses bf16 MXU operands + approx softmax reciprocal -> loose tol.)
    x_ref = jnp.take(emb, tokens, axis=0) * math.sqrt(d_model) + pe[:S][None]
    ref_mask = jnp.where(tokens == vocab.pad_index, -1e30, 0.0)[:, None, :].astype(jnp.float32)
    for p in layer_params:
        x_ref = _ref_layer(x_ref, ref_mask, p, num_heads)

    assert out.shape == (B, S, d_model)
    assert pad_mask is not None and pad_mask.shape == (B, S)
    max_err = float(jnp.max(jnp.abs(out - x_ref)))
    assert jnp.allclose(out, x_ref, atol=5e-2, rtol=5e-2), f"max abs err {max_err}"

    print("KERNEL_OK")
</pallas_src>

<mosaic_0001>
module attributes {stable_mosaic.version = 11 : i64} {
  func.func @_fused_encoder_kernel(%arg0: i32, %arg1: i32, %arg2: memref<2x8x16xf32, #tpu.memory_space<vmem>>, %arg3: memref<2x1x8xf32, #tpu.memory_space<vmem>>, %arg4: memref<1x16x48xbf16, #tpu.memory_space<vmem>>, %arg5: memref<1x1x48xf32, #tpu.memory_space<vmem>>, %arg6: memref<1x16x16xbf16, #tpu.memory_space<vmem>>, %arg7: memref<1x1x16xf32, #tpu.memory_space<vmem>>, %arg8: memref<1x1x16xf32, #tpu.memory_space<vmem>>, %arg9: memref<1x1x16xf32, #tpu.memory_space<vmem>>, %arg10: memref<1x16x32xbf16, #tpu.memory_space<vmem>>, %arg11: memref<1x1x32xf32, #tpu.memory_space<vmem>>, %arg12: memref<1x32x16xbf16, #tpu.memory_space<vmem>>, %arg13: memref<1x1x16xf32, #tpu.memory_space<vmem>>, %arg14: memref<1x1x16xf32, #tpu.memory_space<vmem>>, %arg15: memref<1x1x16xf32, #tpu.memory_space<vmem>>, %arg16: memref<2x8x16xf32, #tpu.memory_space<vmem>>) attributes {dimension_semantics = [#tpu.dimension_semantics<parallel>, #tpu.dimension_semantics<arbitrary>], iteration_bounds = array<i64: 1, 2>, scalar_prefetch = 0 : i64, scratch_operands = 0 : i64, tpu.core_type = #tpu.core_type<tc>, window_params = [{transform_indices = @transform_0, window_bounds = array<i64: 2, 8, 16>}, {transform_indices = @transform_1, window_bounds = array<i64: 2, 1, 8>}, {transform_indices = @transform_2, window_bounds = array<i64: 1, 16, 48>}, {transform_indices = @transform_3, window_bounds = array<i64: 1, 1, 48>}, {transform_indices = @transform_4, window_bounds = array<i64: 1, 16, 16>}, {transform_indices = @transform_5, window_bounds = array<i64: 1, 1, 16>}, {transform_indices = @transform_6, window_bounds = array<i64: 1, 1, 16>}, {transform_indices = @transform_7, window_bounds = array<i64: 1, 1, 16>}, {transform_indices = @transform_8, window_bounds = array<i64: 1, 16, 32>}, {transform_indices = @transform_9, window_bounds = array<i64: 1, 1, 32>}, {transform_indices = @transform_10, window_bounds = array<i64: 1, 32, 16>}, {transform_indices = @transform_11, window_bounds = array<i64: 1, 1, 16>}, {transform_indices = @transform_12, window_bounds = array<i64: 1, 1, 16>}, {transform_indices = @transform_13, window_bounds = array<i64: 1, 1, 16>}, {transform_indices = @transform_14, window_bounds = array<i64: 2, 8, 16>}]} {
    %c0_i32 = arith.constant 0 : i32
    %0 = arith.cmpi eq, %arg1, %c0_i32 : i32
    %1 = arith.extui %0 : i1 to i32
    %c0_i32_0 = arith.constant 0 : i32
    %2 = arith.cmpi ne, %1, %c0_i32_0 : i32
    scf.if %2 {
      %c0_67 = arith.constant 0 : index
      %c0_68 = arith.constant 0 : index
      %c0_69 = arith.constant 0 : index
      %141 = vector.load %arg2[%c0_67, %c0_68, %c0_69] : memref<2x8x16xf32, #tpu.memory_space<vmem>>, vector<2x8x16xf32>
      %c0_70 = arith.constant 0 : index
      %c0_71 = arith.constant 0 : index
      %c0_72 = arith.constant 0 : index
      %142 = vector.load %arg16[%c0_70, %c0_71, %c0_72] : memref<2x8x16xf32, #tpu.memory_space<vmem>>, vector<2x8x16xf32>
      tpu.vector_store %arg16[%c0_70, %c0_71, %c0_72], %141 {strides = array<i32>} : memref<2x8x16xf32, #tpu.memory_space<vmem>>, vector<2x8x16xf32>,
    } else {
    }
    %c0 = arith.constant 0 : index
    %c0_1 = arith.constant 0 : index
    %c0_2 = arith.constant 0 : index
    %3 = vector.load %arg16[%c0, %c0_1, %c0_2] : memref<2x8x16xf32, #tpu.memory_space<vmem>>, vector<2x8x16xf32>
    %4 = vector.shape_cast %3 : vector<2x8x16xf32> to vector<16x16xf32>
    %5 = arith.truncf %4 : vector<16x16xf32> to vector<16x16xbf16>
    %c0_3 = arith.constant 0 : index
    %c0_4 = arith.constant 0 : index
    %c0_5 = arith.constant 0 : index
    %6 = vector.load %arg4[%c0_3, %c0_4, %c0_5] : memref<1x16x48xbf16, #tpu.memory_space<vmem>>, vector<1x16x48xbf16>
    %7 = vector.shape_cast %6 : vector<1x16x48xbf16> to vector<16x48xbf16>
    %cst = arith.constant dense<0.000000e+00> : vector<16x48xf32>
    %8 = tpu.matmul %5, %7, %cst {dimension_numbers = #tpu.dot_dimension_numbers<[1], [0], [0], [1], [0, 0, 1, 1], [], []>} : vector<16x16xbf16>, vector<16x48xbf16>, vector<16x48xf32> -> vector<16x48xf32>
    %c0_6 = arith.constant 0 : index
    %c0_7 = arith.constant 0 : index
    %c0_8 = arith.constant 0 : index
    %9 = vector.load %arg5[%c0_6, %c0_7, %c0_8] : memref<1x1x48xf32, #tpu.memory_space<vmem>>, vector<1x1x48xf32>
    %10 = vector.shape_cast %9 : vector<1x1x48xf32> to vector<1x48xf32>
    %11 = vector.broadcast %10 : vector<1x48xf32> to vector<16x48xf32>
    %12 = arith.addf %8, %11 : vector<16x48xf32>
    %13 = vector.shape_cast %12 : vector<16x48xf32> to vector<2x8x48xf32>
    %c0_9 = arith.constant 0 : index
    %c0_10 = arith.constant 0 : index
    %c0_11 = arith.constant 0 : index
    %14 = vector.load %arg3[%c0_9, %c0_10, %c0_11] : memref<2x1x8xf32, #tpu.memory_space<vmem>>, vector<2x1x8xf32>
    %15 = vector.extract_strided_slice %13 {offsets = [0, 0, 0], sizes = [2, 8, 8], strides = [1, 1, 1]} : vector<2x8x48xf32> to vector<2x8x8xf32>
    %16 = arith.truncf %15 : vector<2x8x8xf32> to vector<2x8x8xbf16>
    %17 = vector.extract_strided_slice %13 {offsets = [0, 0, 16], sizes = [2, 8, 8], strides = [1, 1, 1]} : vector<2x8x48xf32> to vector<2x8x8xf32>
    %18 = arith.truncf %17 : vector<2x8x8xf32> to vector<2x8x8xbf16>
    %19 = vector.extract_strided_slice %13 {offsets = [0, 0, 32], sizes = [2, 8, 8], strides = [1, 1, 1]} : vector<2x8x48xf32> to vector<2x8x8xf32>
    %20 = arith.truncf %19 : vector<2x8x8xf32> to vector<2x8x8xbf16>
    "tpu.trace_start"() <{level = 10 : i32, message = "bqd,bkd->bqk"}> : () -> ()
    %cst_12 = arith.constant dense<0.000000e+00> : vector<2x8x8xf32>
    %21 = tpu.matmul %16, %18, %cst_12 {dimension_numbers = #tpu.dot_dimension_numbers<[2], [2], [1], [1], [0, 0, 0, 1, 1, 1], [0], [0]>} : vector<2x8x8xbf16>, vector<2x8x8xbf16>, vector<2x8x8xf32> -> vector<2x8x8xf32>
    "tpu.trace_stop"() : () -> ()
    %22 = vector.broadcast %14 : vector<2x1x8xf32> to vector<2x8x8xf32>
    %23 = arith.addf %21, %22 : vector<2x8x8xf32>
    %cst_13 = arith.constant dense<0xFF800000> : vector<2x8xf32>
    %24 = vector.multi_reduction <maximumf>, %23, %cst_13 [2] : vector<2x8x8xf32> to vector<2x8xf32>
    %25 = vector.shape_cast %24 : vector<2x8xf32> to vector<2x8x1xf32>
    %26 = vector.broadcast %25 : vector<2x8x1xf32> to vector<2x8x8xf32>
    %27 = arith.subf %23, %26 : vector<2x8x8xf32>
    %28 = math.exp %27 : vector<2x8x8xf32>
    %cst_14 = arith.constant dense<0.000000e+00> : vector<2x8xf32>
    %29 = vector.multi_reduction <add>, %28, %cst_14 [2] : vector<2x8x8xf32> to vector<2x8xf32>
    %30 = vector.shape_cast %29 : vector<2x8xf32> to vector<2x8x1xf32>
    %31 = tpu.reciprocal %30 {approx = true} : vector<2x8x1xf32> -> vector<2x8x1xf32>
    %32 = vector.broadcast %31 : vector<2x8x1xf32> to vector<2x8x8xf32>
    %33 = arith.mulf %28, %32 : vector<2x8x8xf32>
    %34 = arith.truncf %33 : vector<2x8x8xf32> to vector<2x8x8xbf16>
    "tpu.trace_start"() <{level = 10 : i32, message = "bqk,bkd->bqd"}> : () -> ()
    %cst_15 = arith.constant dense<0.000000e+00> : vector<2x8x8xf32>
    %35 = tpu.matmul %34, %20, %cst_15 {dimension_numbers = #tpu.dot_dimension_numbers<[2], [1], [1], [2], [0, 0, 0, 1, 1, 2], [0], [0]>} : vector<2x8x8xbf16>, vector<2x8x8xbf16>, vector<2x8x8xf32> -> vector<2x8x8xf32>
    "tpu.trace_stop"() : () -> ()
    %36 = vector.extract_strided_slice %13 {offsets = [0, 0, 8], sizes = [2, 8, 8], strides = [1, 1, 1]} : vector<2x8x48xf32> to vector<2x8x8xf32>
    %37 = arith.truncf %36 : vector<2x8x8xf32> to vector<2x8x8xbf16>
    %38 = vector.extract_strided_slice %13 {offsets = [0, 0, 24], sizes = [2, 8, 8], strides = [1, 1, 1]} : vector<2x8x48xf32> to vector<2x8x8xf32>
    %39 = arith.truncf %38 : vector<2x8x8xf32> to vector<2x8x8xbf16>
    %40 = vector.extract_strided_slice %13 {offsets = [0, 0, 40], sizes = [2, 8, 8], strides = [1, 1, 1]} : vector<2x8x48xf32> to vector<2x8x8xf32>
    %41 = arith.truncf %40 : vector<2x8x8xf32> to vector<2x8x8xbf16>
    "tpu.trace_start"() <{level = 10 : i32, message = "bqd,bkd->bqk"}> : () -> ()
    %cst_16 = arith.constant dense<0.000000e+00> : vector<2x8x8xf32>
    %42 = tpu.matmul %37, %39, %cst_16 {dimension_numbers = #tpu.dot_dimension_numbers<[2], [2], [1], [1], [0, 0, 0, 1, 1, 1], [0], [0]>} : vector<2x8x8xbf16>, vector<2x8x8xbf16>, vector<2x8x8xf32> -> vector<2x8x8xf32>
    "tpu.trace_stop"() : () -> ()
    %43 = vector.broadcast %14 : vector<2x1x8xf32> to vector<2x8x8xf32>
    %44 = arith.addf %42, %43 : vector<2x8x8xf32>
    %cst_17 = arith.constant dense<0xFF800000> : vector<2x8xf32>
    %45 = vector.multi_reduction <maximumf>, %44, %cst_17 [2] : vector<2x8x8xf32> to vector<2x8xf32>
    %46 = vector.shape_cast %45 : vector<2x8xf32> to vector<2x8x1xf32>
    %47 = vector.broadcast %46 : vector<2x8x1xf32> to vector<2x8x8xf32>
    %48 = arith.subf %44, %47 : vector<2x8x8xf32>
    %49 = math.exp %48 : vector<2x8x8xf32>
    %cst_18 = arith.constant dense<0.000000e+00> : vector<2x8xf32>
    %50 = vector.multi_reduction <add>, %49, %cst_18 [2] : vector<2x8x8xf32> to vector<2x8xf32>
    %51 = vector.shape_cast %50 : vector<2x8xf32> to vector<2x8x1xf32>
    %52 = tpu.reciprocal %51 {approx = true} : vector<2x8x1xf32> -> vector<2x8x1xf32>
    %53 = vector.broadcast %52 : vector<2x8x1xf32> to vector<2x8x8xf32>
    %54 = arith.mulf %49, %53 : vector<2x8x8xf32>
    %55 = arith.truncf %54 : vector<2x8x8xf32> to vector<2x8x8xbf16>
    "tpu.trace_start"() <{level = 10 : i32, message = "bqk,bkd->bqd"}> : () -> ()
    %cst_19 = arith.constant dense<0.000000e+00> : vector<2x8x8xf32>
    %56 = tpu.matmul %55, %41, %cst_19 {dimension_numbers = #tpu.dot_dimension_numbers<[2], [1], [1], [2], [0, 0, 0, 1, 1, 2], [0], [0]>} : vector<2x8x8xbf16>, vector<2x8x8xbf16>, vector<2x8x8xf32> -> vector<2x8x8xf32>
    "tpu.trace_stop"() : () -> ()
    %57 = tpu.concatenate %35, %56 in 2 : vector<2x8x8xf32>, vector<2x8x8xf32> -> vector<2x8x16xf32>
    %58 = vector.shape_cast %57 : vector<2x8x16xf32> to vector<16x16xf32>
    %59 = arith.truncf %58 : vector<16x16xf32> to vector<16x16xbf16>
    %c0_20 = arith.constant 0 : index
    %c0_21 = arith.constant 0 : index
    %c0_22 = arith.constant 0 : index
    %60 = vector.load %arg6[%c0_20, %c0_21, %c0_22] : memref<1x16x16xbf16, #tpu.memory_space<vmem>>, vector<1x16x16xbf16>
    %61 = vector.shape_cast %60 : vector<1x16x16xbf16> to vector<16x16xbf16>
    %cst_23 = arith.constant dense<0.000000e+00> : vector<16x16xf32>
    %62 = tpu.matmul %59, %61, %cst_23 {dimension_numbers = #tpu.dot_dimension_numbers<[1], [0], [0], [1], [0, 0, 1, 1], [], []>} : vector<16x16xbf16>, vector<16x16xbf16>, vector<16x16xf32> -> vector<16x16xf32>
    %c0_24 = arith.constant 0 : index
    %c0_25 = arith.constant 0 : index
    %c0_26 = arith.constant 0 : index
    %63 = vector.load %arg7[%c0_24, %c0_25, %c0_26] : memref<1x1x16xf32, #tpu.memory_space<vmem>>, vector<1x1x16xf32>
    %64 = vector.shape_cast %63 : vector<1x1x16xf32> to vector<1x16xf32>
    %65 = vector.broadcast %64 : vector<1x16xf32> to vector<16x16xf32>
    %66 = arith.addf %62, %65 : vector<16x16xf32>
    %67 = arith.addf %4, %66 : vector<16x16xf32>
    %c0_27 = arith.constant 0 : index
    %c0_28 = arith.constant 0 : index
    %c0_29 = arith.constant 0 : index
    %68 = vector.load %arg8[%c0_27, %c0_28, %c0_29] : memref<1x1x16xf32, #tpu.memory_space<vmem>>, vector<1x1x16xf32>
    %69 = vector.shape_cast %68 : vector<1x1x16xf32> to vector<1x16xf32>
    %c0_30 = arith.constant 0 : index
    %c0_31 = arith.constant 0 : index
    %c0_32 = arith.constant 0 : index
    %70 = vector.load %arg9[%c0_30, %c0_31, %c0_32] : memref<1x1x16xf32, #tpu.memory_space<vmem>>, vector<1x1x16xf32>
    %71 = vector.shape_cast %70 : vector<1x1x16xf32> to vector<1x16xf32>
    %cst_33 = arith.constant dense<0.000000e+00> : vector<16xf32>
    %72 = vector.multi_reduction <add>, %67, %cst_33 [1] : vector<16x16xf32> to vector<16xf32>
    %73 = vector.shape_cast %72 : vector<16xf32> to vector<16x1xf32>
    %cst_34 = arith.constant 1.600000e+01 : f32
    %74 = vector.broadcast %cst_34 : f32 to vector<16x1xf32>
    %75 = arith.divf %73, %74 : vector<16x1xf32>
    %76 = vector.broadcast %75 : vector<16x1xf32> to vector<16x16xf32>
    %77 = arith.subf %67, %76 : vector<16x16xf32>
    %78 = arith.mulf %77, %77 : vector<16x16xf32>
    %cst_35 = arith.constant dense<0.000000e+00> : vector<16xf32>
    %79 = vector.multi_reduction <add>, %78, %cst_35 [1] : vector<16x16xf32> to vector<16xf32>
    %80 = vector.shape_cast %79 : vector<16xf32> to vector<16x1xf32>
    %cst_36 = arith.constant 1.600000e+01 : f32
    %81 = vector.broadcast %cst_36 : f32 to vector<16x1xf32>
    %82 = arith.divf %80, %81 : vector<16x1xf32>
    %83 = vector.broadcast %75 : vector<16x1xf32> to vector<16x16xf32>
    %84 = arith.subf %67, %83 : vector<16x16xf32>
    %cst_37 = arith.constant 9.99999974E-6 : f32
    %85 = vector.broadcast %cst_37 : f32 to vector<16x1xf32>
    %86 = arith.addf %82, %85 : vector<16x1xf32>
    %87 = math.rsqrt %86 : vector<16x1xf32>
    %88 = vector.broadcast %87 : vector<16x1xf32> to vector<16x16xf32>
    %89 = arith.mulf %84, %88 : vector<16x16xf32>
    %90 = vector.broadcast %69 : vector<1x16xf32> to vector<16x16xf32>
    %91 = arith.mulf %89, %90 : vector<16x16xf32>
    %92 = vector.broadcast %71 : vector<1x16xf32> to vector<16x16xf32>
    %93 = arith.addf %91, %92 : vector<16x16xf32>
    %94 = arith.truncf %93 : vector<16x16xf32> to vector<16x16xbf16>
    %c0_38 = arith.constant 0 : index
    %c0_39 = arith.constant 0 : index
    %c0_40 = arith.constant 0 : index
    %95 = vector.load %arg10[%c0_38, %c0_39, %c0_40] : memref<1x16x32xbf16, #tpu.memory_space<vmem>>, vector<1x16x32xbf16>
    %96 = vector.shape_cast %95 : vector<1x16x32xbf16> to vector<16x32xbf16>
    %cst_41 = arith.constant dense<0.000000e+00> : vector<16x32xf32>
    %97 = tpu.matmul %94, %96, %cst_41 {dimension_numbers = #tpu.dot_dimension_numbers<[1], [0], [0], [1], [0, 0, 1, 1], [], []>} : vector<16x16xbf16>, vector<16x32xbf16>, vector<16x32xf32> -> vector<16x32xf32>
    %c0_42 = arith.constant 0 : index
    %c0_43 = arith.constant 0 : index
    %c0_44 = arith.constant 0 : index
    %98 = vector.load %arg11[%c0_42, %c0_43, %c0_44] : memref<1x1x32xf32, #tpu.memory_space<vmem>>, vector<1x1x32xf32>
    %99 = vector.shape_cast %98 : vector<1x1x32xf32> to vector<1x32xf32>
    %100 = vector.broadcast %99 : vector<1x32xf32> to vector<16x32xf32>
    %101 = arith.addf %97, %100 : vector<16x32xf32>
    %cst_45 = arith.constant 0.000000e+00 : f32
    %102 = vector.broadcast %cst_45 : f32 to vector<16x32xf32>
    %103 = arith.maximumf %101, %102 : vector<16x32xf32>
    %104 = arith.truncf %103 : vector<16x32xf32> to vector<16x32xbf16>
    %c0_46 = arith.constant 0 : index
    %c0_47 = arith.constant 0 : index
    %c0_48 = arith.constant 0 : index
    %105 = vector.load %arg12[%c0_46, %c0_47, %c0_48] : memref<1x32x16xbf16, #tpu.memory_space<vmem>>, vector<1x32x16xbf16>
    %106 = vector.shape_cast %105 : vector<1x32x16xbf16> to vector<32x16xbf16>
    %cst_49 = arith.constant dense<0.000000e+00> : vector<16x16xf32>
    %107 = tpu.matmul %104, %106, %cst_49 {dimension_numbers = #tpu.dot_dimension_numbers<[1], [0], [0], [1], [0, 0, 1, 1], [], []>} : vector<16x32xbf16>, vector<32x16xbf16>, vector<16x16xf32> -> vector<16x16xf32>
    %c0_50 = arith.constant 0 : index
    %c0_51 = arith.constant 0 : index
    %c0_52 = arith.constant 0 : index
    %108 = vector.load %arg13[%c0_50, %c0_51, %c0_52] : memref<1x1x16xf32, #tpu.memory_space<vmem>>, vector<1x1x16xf32>
    %109 = vector.shape_cast %108 : vector<1x1x16xf32> to vector<1x16xf32>
    %110 = vector.broadcast %109 : vector<1x16xf32> to vector<16x16xf32>
    %111 = arith.addf %107, %110 : vector<16x16xf32>
    %112 = arith.addf %93, %111 : vector<16x16xf32>
    %c0_53 = arith.constant 0 : index
    %c0_54 = arith.constant 0 : index
    %c0_55 = arith.constant 0 : index
    %113 = vector.load %arg14[%c0_53, %c0_54, %c0_55] : memref<1x1x16xf32, #tpu.memory_space<vmem>>, vector<1x1x16xf32>
    %114 = vector.shape_cast %113 : vector<1x1x16xf32> to vector<1x16xf32>
    %c0_56 = arith.constant 0 : index
    %c0_57 = arith.constant 0 : index
    %c0_58 = arith.constant 0 : index
    %115 = vector.load %arg15[%c0_56, %c0_57, %c0_58] : memref<1x1x16xf32, #tpu.memory_space<vmem>>, vector<1x1x16xf32>
    %116 = vector.shape_cast %115 : vector<1x1x16xf32> to vector<1x16xf32>
    %cst_59 = arith.constant dense<0.000000e+00> : vector<16xf32>
    %117 = vector.multi_reduction <add>, %112, %cst_59 [1] : vector<16x16xf32> to vector<16xf32>
    %118 = vector.shape_cast %117 : vector<16xf32> to vector<16x1xf32>
    %cst_60 = arith.constant 1.600000e+01 : f32
    %119 = vector.broadcast %cst_60 : f32 to vector<16x1xf32>
    %120 = arith.divf %118, %119 : vector<16x1xf32>
    %121 = vector.broadcast %120 : vector<16x1xf32> to vector<16x16xf32>
    %122 = arith.subf %112, %121 : vector<16x16xf32>
    %123 = arith.mulf %122, %122 : vector<16x16xf32>
    %cst_61 = arith.constant dense<0.000000e+00> : vector<16xf32>
    %124 = vector.multi_reduction <add>, %123, %cst_61 [1] : vector<16x16xf32> to vector<16xf32>
    %125 = vector.shape_cast %124 : vector<16xf32> to vector<16x1xf32>
    %cst_62 = arith.constant 1.600000e+01 : f32
    %126 = vector.broadcast %cst_62 : f32 to vector<16x1xf32>
    %127 = arith.divf %125, %126 : vector<16x1xf32>
    %128 = vector.broadcast %120 : vector<16x1xf32> to vector<16x16xf32>
    %129 = arith.subf %112, %128 : vector<16x16xf32>
    %cst_63 = arith.constant 9.99999974E-6 : f32
    %130 = vector.broadcast %cst_63 : f32 to vector<16x1xf32>
    %131 = arith.addf %127, %130 : vector<16x1xf32>
    %132 = math.rsqrt %131 : vector<16x1xf32>
    %133 = vector.broadcast %132 : vector<16x1xf32> to vector<16x16xf32>
    %134 = arith.mulf %129, %133 : vector<16x16xf32>
    %135 = vector.broadcast %114 : vector<1x16xf32> to vector<16x16xf32>
    %136 = arith.mulf %134, %135 : vector<16x16xf32>
    %137 = vector.broadcast %116 : vector<1x16xf32> to vector<16x16xf32>
    %138 = arith.addf %136, %137 : vector<16x16xf32>
    %139 = vector.shape_cast %138 : vector<16x16xf32> to vector<2x8x16xf32>
    %c0_64 = arith.constant 0 : index
    %c0_65 = arith.constant 0 : index
    %c0_66 = arith.constant 0 : index
    %140 = vector.load %arg16[%c0_64, %c0_65, %c0_66] : memref<2x8x16xf32, #tpu.memory_space<vmem>>, vector<2x8x16xf32>
    tpu.vector_store %arg16[%c0_64, %c0_65, %c0_66], %139 {strides = array<i32>} : memref<2x8x16xf32, #tpu.memory_space<vmem>>, vector<2x8x16xf32>,
    return
  }
  func.func @transform_0(%arg0: i32, %arg1: i32) -> (i32, i32, i32) {
    %c0_i32 = arith.constant 0 : i32
    %c0_i32_0 = arith.constant 0 : i32
    %c0_i32_1 = arith.constant 0 : i32
    return %arg0, %c0_i32, %c0_i32_0 : i32, i32, i32
  }
  func.func @transform_1(%arg0: i32, %arg1: i32) -> (i32, i32, i32) {
    %c0_i32 = arith.constant 0 : i32
    %c0_i32_0 = arith.constant 0 : i32
    %c0_i32_1 = arith.constant 0 : i32
    return %arg0, %c0_i32, %c0_i32_0 : i32, i32, i32
  }
  func.func @transform_2(%arg0: i32, %arg1: i32) -> (i32, i32, i32) {
    %c0_i32 = arith.constant 0 : i32
    %c0_i32_0 = arith.constant 0 : i32
    %c0_i32_1 = arith.constant 0 : i32
    return %arg1, %c0_i32, %c0_i32_0 : i32, i32, i32
  }
  func.func @transform_3(%arg0: i32, %arg1: i32) -> (i32, i32, i32) {
    %c0_i32 = arith.constant 0 : i32
    %c0_i32_0 = arith.constant 0 : i32
    %c0_i32_1 = arith.constant 0 : i32
    return %arg1, %c0_i32, %c0_i32_0 : i32, i32, i32
  }
  func.func @transform_4(%arg0: i32, %arg1: i32) -> (i32, i32, i32) {
    %c0_i32 = arith.constant 0 : i32
    %c0_i32_0 = arith.constant 0 : i32
    %c0_i32_1 = arith.constant 0 : i32
    return %arg1, %c0_i32, %c0_i32_0 : i32, i32, i32
  }
  func.func @transform_5(%arg0: i32, %arg1: i32) -> (i32, i32, i32) {
    %c0_i32 = arith.constant 0 : i32
    %c0_i32_0 = arith.constant 0 : i32
    %c0_i32_1 = arith.constant 0 : i32
    return %arg1, %c0_i32, %c0_i32_0 : i32, i32, i32
  }
  func.func @transform_6(%arg0: i32, %arg1: i32) -> (i32, i32, i32) {
    %c0_i32 = arith.constant 0 : i32
    %c0_i32_0 = arith.constant 0 : i32
    %c0_i32_1 = arith.constant 0 : i32
    return %arg1, %c0_i32, %c0_i32_0 : i32, i32, i32
  }
  func.func @transform_7(%arg0: i32, %arg1: i32) -> (i32, i32, i32) {
    %c0_i32 = arith.constant 0 : i32
    %c0_i32_0 = arith.constant 0 : i32
    %c0_i32_1 = arith.constant 0 : i32
    return %arg1, %c0_i32, %c0_i32_0 : i32, i32, i32
  }
  func.func @transform_8(%arg0: i32, %arg1: i32) -> (i32, i32, i32) {
    %c0_i32 = arith.constant 0 : i32
    %c0_i32_0 = arith.constant 0 : i32
    %c0_i32_1 = arith.constant 0 : i32
    return %arg1, %c0_i32, %c0_i32_0 : i32, i32, i32
  }
  func.func @transform_9(%arg0: i32, %arg1: i32) -> (i32, i32, i32) {
    %c0_i32 = arith.constant 0 : i32
    %c0_i32_0 = arith.constant 0 : i32
    %c0_i32_1 = arith.constant 0 : i32
    return %arg1, %c0_i32, %c0_i32_0 : i32, i32, i32
  }
  func.func @transform_10(%arg0: i32, %arg1: i32) -> (i32, i32, i32) {
    %c0_i32 = arith.constant 0 : i32
    %c0_i32_0 = arith.constant 0 : i32
    %c0_i32_1 = arith.constant 0 : i32
    return %arg1, %c0_i32, %c0_i32_0 : i32, i32, i32
  }
  func.func @transform_11(%arg0: i32, %arg1: i32) -> (i32, i32, i32) {
    %c0_i32 = arith.constant 0 : i32
    %c0_i32_0 = arith.constant 0 : i32
    %c0_i32_1 = arith.constant 0 : i32
    return %arg1, %c0_i32, %c0_i32_0 : i32, i32, i32
  }
  func.func @transform_12(%arg0: i32, %arg1: i32) -> (i32, i32, i32) {
    %c0_i32 = arith.constant 0 : i32
    %c0_i32_0 = arith.constant 0 : i32
    %c0_i32_1 = arith.constant 0 : i32
    return %arg1, %c0_i32, %c0_i32_0 : i32, i32, i32
  }
  func.func @transform_13(%arg0: i32, %arg1: i32) -> (i32, i32, i32) {
    %c0_i32 = arith.constant 0 : i32
    %c0_i32_0 = arith.constant 0 : i32
    %c0_i32_1 = arith.constant 0 : i32
    return %arg1, %c0_i32, %c0_i32_0 : i32, i32, i32
  }
  func.func @transform_14(%arg0: i32, %arg1: i32) -> (i32, i32, i32) {
    %c0_i32 = arith.constant 0 : i32
    %c0_i32_0 = arith.constant 0 : i32
    %c0_i32_1 = arith.constant 0 : i32
    return %arg0, %c0_i32, %c0_i32_0 : i32, i32, i32
  }
}

</mosaic_0001>

<bundles_post_ra>
// kernel: transformer_encoder_forward.1
= control target key start
LH: loop header
LB: loop body
LE: loop exit
PB: predicated region body
PF: predicated region fallthrough
CT: control target
= control target key end

     0   :  { %s2360_s0 = inlined_call_operand.vmem [shape: f32[2,8,16], index: 0, kind: input, shape index: {}]   ;;  %s2361_s1 = inlined_call_operand.vmem [shape: f32[2,1,8], index: 1, kind: input, shape index: {}]   ;;  %s2362_s2 = inlined_call_operand.vmem [shape: bf16[2,16,48], index: 2, kind: input, shape index: {}]   ;;  %s2363_s3 = inlined_call_operand.vmem [shape: f32[2,1,48], index: 3, kind: input, shape index: {}]   ;;  %s2364_s4 = inlined_call_operand.vmem [shape: bf16[2,16,16], index: 4, kind: input, shape index: {}]   ;;  %s2365_s5 = inlined_call_operand.vmem [shape: f32[2,1,16], index: 5, kind: input, shape index: {}]   ;;  %s2366_s6 = inlined_call_operand.vmem [shape: f32[2,1,16], index: 6, kind: input, shape index: {}]   ;;  %s2367_s7 = inlined_call_operand.vmem [shape: f32[2,1,16], index: 7, kind: input, shape index: {}]   ;;  %s2368_s8 = inlined_call_operand.vmem [shape: bf16[2,16,32], index: 8, kind: input, shape index: {}]   ;;  %s2369_s9 = inlined_call_operand.vmem [shape: f32[2,1,32], index: 9, kind: input, shape index: {}]   ;;  %s2370_s10 = inlined_call_operand.vmem [shape: bf16[2,32,16], index: 10, kind: input, shape index: {}]   ;;  %s2371_s11 = inlined_call_operand.vmem [shape: f32[2,1,16], index: 11, kind: input, shape index: {}]   ;;  %s2372_s12 = inlined_call_operand.vmem [shape: f32[2,1,16], index: 12, kind: input, shape index: {}]   ;;  %s2373_s13 = inlined_call_operand.vmem [shape: f32[2,1,16], index: 13, kind: input, shape index: {}]   ;;  %s2374_s14 = inlined_call_operand.hbm [shape: f32[2,8,16], index: 14, kind: output, shape index: {}]  }
   0x1   :  { %2380 = sst [smem:[#allocation8_spill]] %s2360_s0 }
   0x2   :  { %2381 = sst [smem:[#allocation9_spill]] %s2361_s1 }
   0x3   :  { %2382 = sst [smem:[#allocation10_spill]] %s2362_s2 }
   0x4   :  { %2383 = sst [smem:[#allocation11_spill]] %s2363_s3 }
   0x5   :  { %2384 = sst [smem:[#allocation12_spill]] %s2374_s14 }
   0x6   :  { %19 = vsyncpa [#allocation3], 0  ;;  %s2069_s29 = smov 0   ;;  %s2071_s30 = smov 0  }
   0x7   :  { %s2073_s15 = smov 0  }
   0x8 LB: > { %2385 = sst [smem:[#allocation5_spill]] %s1978_s30  ;;  %s34_s17 = sadd.s32 1, %s1978_s30  ;;  %s1982_s15 = sphi %s2073_s15, %s25_s15   ;;  %s1978_s30 = sphi %s2071_s30, %s2405_s30   ;;  %s1974_s29 = sphi %s2069_s29, %s2404_s29  }
   0x9   : > { %2386 = sst [smem:[#allocation6_spill]] %s1982_s15  ;;  %p35_p0 = scmp.ge.s32.totalorder %s34_s17, 2 }
   0xa   : > { %p1712_p1 = scmp.ge.s32.totalorder %s1982_s15, 1  ;;  %p540_p2 = scmp.lt.s32.totalorder %s1982_s15, 3 }
   0xb   : > { %s2407_s17 = smov (%p35_p0, %s34_s17), 0 }
   0xc   : > { %2387 = sst [smem:[#allocation7_spill]] %s2407_s17  ;;  %p541_p3 = pnand %p1712_p1, %p540_p2 }
   0xd   : > { %p640_p4 = scmp.lt.s32.totalorder (!%p541_p3), %s1974_s29, 1  ;;  %s2389_s2 = sld [smem:[#allocation10_spill]] (!%p541_p3) }
   0xe   : > { %544 = sbr.rel (%p541_p3) target bundleno = 3090 (0xc12), region = 76  ;;  %p1721_p5 = scmp.ne.s32.totalorder (!%p541_p3), %s1974_s29, 0 }
  0x15   : > { %s2088_s18 = scalar_select %p640_p4, %s1974_s29, 1 }
  0x16   : > { %689 = sbr.rel (%p1721_p5) target bundleno = 30 (0x1e), region = 80  ;;  %s2390_s26 = sld [smem:[#allocation8_spill]] (!%p1721_p5)  ;;  %vm692_vm0 = vcmask (!%p1721_p5), 130048  }
  0x17   : > { %s2091_s19 = sshll.u32 %s2088_s18, 3  ;;  %s655_s30 = scalar_lea.vmem %s2365_s5, %s2088_s18 }
  0x18   : > { %s644_s25 = scalar_lea.vmem %s2389_s2, %s2091_s19  ;;  %s1756_s27 = sshll.u32 %s2088_s18, 4 }
  0x19   : > { %s2129_s17 = scalar_lea.vmem %s2370_s10, %s1756_s27  ;;  %s677_s20 = scalar_lea.vmem %s2371_s11, %s2088_s18 }
  0x1a   : > { %s680_s22 = scalar_lea.vmem %s2372_s12, %s2088_s18  ;;  %s683_s23 = scalar_lea.vmem %s2373_s13, %s2088_s18 }
  0x1c   : > { %v690_v0 = vld [vmem:[%s2390_s26] sm:$0xff] (!%p1721_p5)  ;;  %v691_v1 = vld [vmem:[%s2390_s26 + $0x8] sm:$0xff] (!%p1721_p5) }
  0x1d   : > { %693 = vst.msk [vmem:[#allocation2] sm:$0xff] %vm692_vm0, %v690_v0  ;;  %694 = vst.msk [vmem:[#allocation2 + $0x8] sm:$0xff] %vm692_vm0, %v691_v1 }
  0x1e PF: > { %v1901_v2 = vld [vmem:[%s644_s25] sm:$0xff]   ;;  %v1984_v3 = vmov 0.0   ;;  %vm713_vm1 = vcmask 130048   ;;  %vm1985_vm2 = vmmov 0   ;;  %s2391_s16 = sld [smem:[#allocation11_spill]]  ;;  %s1986_s15 = smov 112  }
  0x1f   : > { %1782 = vmatprep.subr.bf16.mxu0 %v1984_v3  ;;  %1788 = vmatprep.subr.bf16.mxu1 %v1984_v3  ;;  %vm777_vm3 = vcmask 64512   ;;  %s2393_s0 = sld [smem:[#allocation9_spill]]  ;;  %s1987_s24 = smov 96   ;;  %vm902_vm4 = vcmask 1043456   ;;  %vm1417_vm5 = vcmask 261120  }
  0x20   : > { %1783 = vmatpush3.bf16.msra.mxu0 %v1901_v2  ;;  %1784 = vmatprep.mubr.msk.bf16.mxu0 %vm1985_vm2, %v1984_v3  ;;  %s1988_s28 = smov 104   ;;  %s1989_s27 = smov 120  }
  0x21   : > { %1794 = vmatprep.subr.bf16.mxu0 %v1984_v3  ;;  %1790 = vmatprep.mubr.msk.bf16.mxu1 %vm1985_vm2, %v1984_v3  ;;  %s1990_s29 = smov 88   ;;  %s2395_s2 = scalar_lea.vmem %s2368_s8, %s2091_s19 }
  0x22   : > { %s2397_s25 = scalar_lea.vmem %s2367_s7, %s2088_s18  ;;  %s2398_s1 = scalar_lea.vmem %s2369_s9, %s2088_s18 }
  0x24   : > { %v2150_v4 = vld [vmem:[#allocation2] sm:$0xff]  ;;  %v2152_v5 = vld [vmem:[#allocation2 + $0x8] sm:$0xff]  ;;  %s2392_s14 = scalar_lea.vmem %s2391_s16, %s2088_s18 }
  0x25   : > { %v697_v6 = vpack.c.bf16 %v2152_v5, %v2150_v4  ;;  %v1722_v7 = vld [vmem:[%s2392_s14] ss:$0 sm:$0xff]  ;;  %v2197_v25 = vld [vmem:[%s2393_s0 + $0x1] ss:$0 sm:$0xff]  ;;  %s2394_s14 = scalar_lea.vmem %s2364_s4, %s2091_s19 }
  0x26   : > { %v2191_v20 = vld [vmem:[%s2393_s0] ss:$0 sm:$0xff] }
  0x27   : > { %1785 = vmatmul.mubr.msk.bf16.vlgmr.msra.gmra.mrb[0].mxu0 %vm713_vm1, %v697_v6 }
  0x28   : > { %1796 = vmatprep.mubr.msk.bf16.mxu0 %vm1985_vm2, %v1984_v3 }
  0xfa   : > { %v751_v8 = vpop.f32.mrb[0].mxu0 }
  0xfb   : > { %v752_v9 = vadd.f32 %v1722_v7, %v751_v8  ;;  %v1786_v10 = vpop.f32.mrb[1].mxu0 }
  0xfc   : > { %v754_v11 = vpop.f32.mrb[2].mxu0 }
  0xfd   : > { %v2170_v12 = vpack.c.bf16 %v752_v9, %v752_v9  ;;  %v755_v13 = vadd.f32 %v1722_v7, %v754_v11  ;;  %v1787_v14 = vpop.f32.mrb[3].mxu0 }
  0xff   : > { %775 = vrot.lane.b32.xlu0 %v2170_v12, %s1986_s15  ;;  %v2173_v15 = vpack.c.bf16 %v755_v13, %v755_v13 }
 0x103   : > { %825 = vrot.lane.b32.xlu0 %v2173_v15, %s1986_s15  ;;  %s1991_s15 = smov 8  }
 0x171   : > { %v776_v16 = vpop.permute.xlu0 %775 }
 0x172   : > { %v782_v17 = vsel %vm777_vm3, %v776_v16, 0 }
 0x173   : > { %1789 = vmatpush3.bf16.xpose.msra.mxu1 %v782_v17 }
 0x174   : > { %1800 = vmatprep.subr.bf16.mxu1 %v1984_v3 }
 0x175   : > { %v826_v18 = vpop.permute.xlu0 %825 }
 0x176   : > { %v831_v19 = vsel %vm777_vm3, %v826_v18, 0 }
 0x177   : > { %1795 = vmatpush3.bf16.xpose.msra.mxu0 %v831_v19 }
 0x178   : > { %1806 = vmatprep.subr.bf16.mxu0 %v1984_v3 }
 0x17a   : > { %1791 = vmatmul.mubr.msk.bf16.vlgmr.msra.gmra.mrb[0].mxu1 %vm777_vm3, %v2170_v12 }
 0x17b   : > { %1802 = vmatprep.mubr.msk.bf16.mxu1 %vm1985_vm2, %v1984_v3 }
 0x17e   : > { %1797 = vmatmul.mubr.msk.bf16.vlgmr.msra.gmra.mrb[4].mxu0 %vm777_vm3, %v2173_v15 }
 0x17f   : > { %1808 = vmatprep.mubr.msk.bf16.mxu0 %vm1985_vm2, %v1984_v3 }
 0x24d   : > { %v818_v21 = vpop.f32.mrb[0].mxu1 }
 0x24e   : > { %v819_v22 = vadd.f32 %v2191_v20, %v818_v21  ;;  %v1792_v23 = vpop.f32.mrb[1].mxu1 }
 0x24f   : > { %v821_v24 = vpop.f32.mrb[2].mxu1 }
 0x250   : > { %v1793_v26 = vpop.f32.mrb[3].mxu1  ;;  %v873_v27 = vsel %vm777_vm3, %v819_v22, -inf }
 0x251   : > { %874 = vmax.xlane.f32.xlu1 %v873_v27  ;;  %v867_v28 = vpop.f32.mrb[4].mxu0 }
 0x252   : > { %v868_v29 = vadd.f32 %v2197_v25, %v867_v28  ;;  %v1798_v30 = vpop.f32.mrb[5].mxu0 }
 0x253   : > { %v870_v31 = vpop.f32.mrb[6].mxu0 }
 0x254   : > { %v1799_v32 = vpop.f32.mrb[7].mxu0  ;;  %v876_v33 = vsel %vm777_vm3, %v868_v29, -inf }
 0x255   : > { %877 = vmax.xlane.f32.xlu1 %v876_v33 }
 0x266   : > { %897 = vrot.lane.b32.xlu1 %v2170_v12, %s1987_s24 }
 0x26a   : > { %946 = vrot.lane.b32.xlu1 %v2173_v15, %s1987_s24 }
 0x26e   : > { %996 = vrot.lane.b32.xlu1 %v2170_v12, %s1988_s28 }
 0x2de   : > { %v875_v34 = vpop.xlane.xlu1 %874 }
 0x2df   : > { %v879_v35 = vsub.f32 %v819_v22, %v875_v34 }
 0x2e1   : > { %v881_v36 = vmul.f32 1.442695, %v879_v35 }
 0x2e2   : > { %v878_v37 = vpop.xlane.xlu1 %877 }
 0x2e3   : > { %1906 = vpow2.f32 %v881_v36  ;;  %v880_v38 = vsub.f32 %v868_v29, %v878_v37 }
 0x2e5   : > { %v883_v39 = vmul.f32 1.442695, %v880_v38 }
 0x2e6   : > { %v898_v40 = vpop.permute.xlu1 %897 }
 0x2e7   : > { %1908 = vpow2.f32 %v883_v39  ;;  %v904_v41 = vsel %vm902_vm4, %v898_v40, 0 }
 0x2e8   : > { %1801 = vmatpush3.bf16.msra.mxu1 %v904_v41 }
 0x2e9   : > { %1812 = vmatprep.subr.bf16.mxu1 %v1984_v3 }
 0x2ea   : > { %v947_v42 = vpop.permute.xlu1 %946 }
 0x2eb   : > { %v952_v43 = vsel %vm902_vm4, %v947_v42, 0 }
 0x2ec   : > { %1807 = vmatpush3.bf16.msra.mxu0 %v952_v43  ;;  %v1902_v43 = vld [vmem:[%s2394_s14] sm:$0xff]  }
 0x2ed   : > { %v1907_v44 = vpop.eup %1906  ;;  %1818 = vmatprep.subr.bf16.mxu0 %v1984_v3 }
 0x2ee   : > { %v885_v45 = vsel %vm777_vm3, %v1907_v44, 0.0  ;;  %v997_v48 = vpop.permute.xlu1 %996 }
 0x2ef   : > { %886 = vadd.xlane.f32.xlu0 %v885_v45  ;;  %v1002_v55 = vsel %vm777_vm3, %v997_v48, 0 }
 0x2f1   : > { %v1909_v46 = vpop.eup %1908 }
 0x2f2   : > { %v888_v47 = vsel %vm777_vm3, %v1909_v46, 0.0 }
 0x2f3   : > { %889 = vadd.xlane.f32.xlu1 %v888_v47 }
 0x304   : > { %1046 = vrot.lane.b32.xlu1 %v2173_v15, %s1988_s28  ;;  %s1992_s28 = smov [#allocation2]  }
 0x305   : > { %994 = vrot.lane.b32.xlu0 %v2170_v12, %s1989_s27 }
 0x308   : > { %1044 = vrot.lane.b32.xlu1 %v2173_v15, %s1989_s27  ;;  %s2396_s27 = scalar_lea.vmem %s2366_s6, %s2088_s18 }
 0x37c   : > { %v887_v49 = vpop.xlane.xlu0 %886 }
 0x37d   : > { %1910 = vrcp.f32 %v887_v49 }
 0x380   : > { %v890_v50 = vpop.xlane.xlu1 %889  ;;  %v995_v60 = vpop.permute.xlu0 %994 }
 0x381   : > { %1912 = vrcp.f32 %v890_v50 }
 0x384   : > { %v1047_v57 = vpop.permute.xlu1 %1046 }
 0x385   : > { %v1052_v59 = vsel %vm777_vm3, %v1047_v57, 0 }
 0x387   : > { %v1911_v51 = vpop.eup %1910 }
 0x388   : > { %v893_v52 = vmul.f32 %v1911_v51, %v1907_v44  ;;  %v1045_v61 = vpop.permute.xlu1 %1044 }
 0x38a   : > { %v895_v53 = vpack.c.bf16 %v893_v52, %v893_v52 }
 0x38b   : > { %v1913_v54 = vpop.eup %1912 }
 0x38c   : > { %v894_v56 = vmul.f32 %v1913_v54, %v1909_v46  ;;  %1803 = vmatmul.mubr.msk.bf16.vlgmr.msra.gmra.mrb[4].mxu1 %vm777_vm3, %v895_v53 }
 0x38d   : > { %1813 = vmatpush3.bf16.xpose.msra.mxu1 %v1002_v55  ;;  %1814 = vmatprep.mubr.msk.bf16.mxu1 %vm1985_vm2, %v1984_v3 }
 0x38e   : > { %v896_v58 = vpack.c.bf16 %v894_v56, %v894_v56  ;;  %1824 = vmatprep.subr.bf16.mxu1 %v1984_v3 }
 0x390   : > { %1809 = vmatmul.mubr.msk.bf16.vlgmr.msra.gmra.mrb[8].mxu0 %vm777_vm3, %v896_v58 }
 0x391   : > { %1819 = vmatpush3.bf16.xpose.msra.mxu0 %v1052_v59  ;;  %1820 = vmatprep.mubr.msk.bf16.mxu0 %vm1985_vm2, %v1984_v3  ;;  %v1735_v59 = vld [vmem:[%s655_s30] ss:$0 sm:$0xff] }
 0x392   : > { %1830 = vmatprep.subr.bf16.mxu0 %v1984_v3 }
 0x394   : > { %1815 = vmatmul.mubr.msk.bf16.vlgmr.msra.gmra.mrb[8].mxu1 %vm777_vm3, %v995_v60 }
 0x395   : > { %1826 = vmatprep.mubr.msk.bf16.mxu1 %vm1985_vm2, %v1984_v3 }
 0x398   : > { %1821 = vmatmul.mubr.msk.bf16.vlgmr.msra.gmra.mrb[12].mxu0 %vm777_vm3, %v1045_v61 }
 0x399   : > { %1832 = vmatprep.mubr.msk.bf16.mxu0 %vm1985_vm2, %v1984_v3 }
 0x45f   : > { %v2230_v62 = vpop.f32.mrb[4].mxu1 }
 0x460   : > { %v1804_v63 = vpop.f32.mrb[5].mxu1 }
 0x461   : > { %v943_v0 = vpop.f32.mrb[6].mxu1 }
 0x462   : > { %v1805_v1 = vpop.f32.mrb[7].mxu1 }
 0x463   : > { %v2232_v2 = vpop.f32.mrb[8].mxu0 }
 0x464   : > { %v1810_v6 = vpop.f32.mrb[9].mxu0 }
 0x465   : > { %v991_v7 = vpop.f32.mrb[10].mxu0 }
 0x466   : > { %v1811_v8 = vpop.f32.mrb[11].mxu0 }
 0x467   : > { %v1038_v9 = vpop.f32.mrb[8].mxu1 }
 0x468   : > { %v1039_v10 = vadd.f32 %v2191_v20, %v1038_v9  ;;  %v1816_v11 = vpop.f32.mrb[9].mxu1 }
 0x469   : > { %v1041_v13 = vpop.f32.mrb[10].mxu1 }
 0x46a   : > { %v1817_v14 = vpop.f32.mrb[11].mxu1  ;;  %v1094_v16 = vsel %vm777_vm3, %v1039_v10, -inf }
 0x46b   : > { %1095 = vmax.xlane.f32.xlu1 %v1094_v16  ;;  %v1088_v17 = vpop.f32.mrb[12].mxu0 }
 0x46c   : > { %v1089_v18 = vadd.f32 %v2197_v25, %v1088_v17  ;;  %v1822_v19 = vpop.f32.mrb[13].mxu0 }
 0x46d   : > { %v1091_v21 = vpop.f32.mrb[14].mxu0 }
 0x46e   : > { %v1823_v22 = vpop.f32.mrb[15].mxu0  ;;  %v1097_v23 = vsel %vm777_vm3, %v1089_v18, -inf }
 0x46f   : > { %1098 = vmax.xlane.f32.xlu0 %v1097_v23 }
 0x485   : > { %1166 = vrot.lane.b32.xlu0 %v2173_v15, %s1990_s29 }
 0x4f8   : > { %v1096_v24 = vpop.xlane.xlu1 %1095 }
 0x4f9   : > { %v1100_v20 = vsub.f32 %v1039_v10, %v1096_v24 }
 0x4fb   : > { %v1102_v26 = vmul.f32 1.442695, %v1100_v20 }
 0x4fc   : > { %v1099_v27 = vpop.xlane.xlu0 %1098 }
 0x4fd   : > { %1914 = vpow2.f32 %v1102_v26  ;;  %v1101_v28 = vsub.f32 %v1089_v18, %v1099_v27 }
 0x4ff   : > { %v1104_v29 = vmul.f32 1.442695, %v1101_v28  ;;  %v1738_v28 = vld [vmem:[%s2396_s27] ss:$0 sm:$0xff]  ;;  %s1519_s27 = sshll.u32 %s1992_s28, 4  ;;  %s1520_s27 = int_to_ptr.vmem [resolvable:$true] %s1519_s27 }
 0x500   : > { %v1167_v30 = vpop.permute.xlu0 %1166  ;;  %s1930_s18 = scalar_lea.vmem %s1520_s27, 256  ;;  %p1937_p10 = scmp.lt.s32.totalorder %s1520_s27, %s1520_s27 }
 0x501   : > { %1916 = vpow2.f32 %v1104_v29  ;;  %v1172_v25 = vsel %vm902_vm4, %v1167_v30, 0  ;;  %p1931_p7 = scmp.ne.s32.totalorder %s1520_s27, %s1930_s18  ;;  %p1938_p11 = scmp.lt.s32.totalorder %s1930_s18, %s1930_s18 }
 0x502   : > { %1831 = vmatpush3.bf16.msra.mxu0 %v1172_v25 }
 0x503   : > { %1842 = vmatprep.subr.bf16.mxu0 %v1984_v3  ;;  %p1939_p12 = por %p1938_p11, %p1937_p10 }
 0x507   : > { %v1915_v31 = vpop.eup %1914 }
 0x508   : > { %v1106_v32 = vsel %vm777_vm3, %v1915_v31, 0.0 }
 0x509   : > { %1107 = vadd.xlane.f32.xlu1 %v1106_v32  ;;  %v1739_v32 = vld [vmem:[%s2397_s25] ss:$0 sm:$0xff] }
 0x50b   : > { %v1917_v33 = vpop.eup %1916 }
 0x50c   : > { %v1109_v15 = vsel %vm777_vm3, %v1917_v33, 0.0 }
 0x50d   : > { %1110 = vadd.xlane.f32.xlu1 %v1109_v15 }
 0x51e   : > { %1118 = vrot.lane.b32.xlu1 %v2170_v12, %s1990_s29 }
 0x596   : > { %v1108_v34 = vpop.xlane.xlu1 %1107 }
 0x597   : > { %1918 = vrcp.f32 %v1108_v34 }
 0x59a   : > { %v1111_v35 = vpop.xlane.xlu1 %1110 }
 0x59b   : > { %1920 = vrcp.f32 %v1111_v35 }
 0x59e   : > { %v1119_v36 = vpop.permute.xlu1 %1118 }
 0x59f   : > { %v1124_v37 = vsel %vm902_vm4, %v1119_v36, 0  ;;  %v1904_v36 = vld [vmem:[%s2129_s17] sm:$0xff]  }
 0x5a0   : > { %1825 = vmatpush3.bf16.msra.mxu1 %v1124_v37  ;;  %v1905_v37 = vld [vmem:[%s2129_s17 + $0x8] sm:$0xff]  }
 0x5a1   : > { %v1919_v38 = vpop.eup %1918  ;;  %1836 = vmatprep.subr.bf16.mxu1 %v1984_v3 }
 0x5a2   : > { %v1114_v39 = vmul.f32 %v1919_v38, %v1915_v31  ;;  %v1740_v38 = vld [vmem:[%s2398_s1] ss:$0 sm:$0xff] }
 0x5a4   : > { %v1116_v40 = vpack.c.bf16 %v1114_v39, %v1114_v39 }
 0x5a5   : > { %v1921_v41 = vpop.eup %1920 }
 0x5a6   : > { %v1115_v42 = vmul.f32 %v1921_v41, %v1917_v33  ;;  %1827 = vmatmul.mubr.msk.bf16.vlgmr.msra.gmra.mrb[12].mxu1 %vm777_vm3, %v1116_v40 }
 0x5a7   : > { %1838 = vmatprep.mubr.msk.bf16.mxu1 %vm1985_vm2, %v1984_v3  ;;  %1837 = vmatpush3.bf16.msra.mxu1 %v1902_v43 }
 0x5a8   : > { %v1117_v12 = vpack.c.bf16 %v1115_v42, %v1115_v42  ;;  %1848 = vmatprep.subr.bf16.mxu1 %v1984_v3 }
 0x5aa   : > { %1833 = vmatmul.mubr.msk.bf16.vlgmr.msra.gmra.mrb[16].mxu0 %vm777_vm3, %v1117_v12 }
 0x5ab   : > { %1844 = vmatprep.mubr.msk.bf16.mxu0 %vm1985_vm2, %v1984_v3 }
 0x679   : > { %v1160_v44 = vpop.f32.mrb[12].mxu1 }
 0x67a   : > { %v1828_v45 = vpop.f32.mrb[13].mxu1 }
 0x67b   : > { %v1163_v46 = vpop.f32.mrb[14].mxu1 }
 0x67c   : > { %v1829_v47 = vpop.f32.mrb[15].mxu1 }
 0x67d   : > { %v1208_v48 = vpop.f32.mrb[16].mxu0 }
 0x67e   : > { %v1896_v49 = vpack.i.bf16 %v1208_v48, %v1160_v44  ;;  %v1834_v50 = vpop.f32.mrb[17].mxu0 }
 0x67f   : > { %v1211_v51 = vpop.f32.mrb[18].mxu0 }
 0x680   : > { %1897 = vrot.lane.b32.xlu1 %v1896_v49, %s1991_s15  ;;  %v1835_v52 = vpop.f32.mrb[19].mxu0 }
 0x6f2   : > { %v1898_v53 = vpop.permute.xlu1 %1897 }
 0x6f3   : > { %v1900_v54 = vunpack.i.h.bf16 %v1898_v53  ;;  %v1899_v55 = vunpack.i.l.bf16 %v1898_v53 }
 0x6f5   : > { %v1223_v56 = vsel %vm777_vm3, %v2232_v2, %v1900_v54  ;;  %v1222_v57 = vsel %vm777_vm3, %v2230_v62, %v1899_v55 }
 0x6f6   : > { %v1224_v58 = vpack.c.bf16 %v1223_v56, %v1222_v57 }
 0x6f8   : > { %1839 = vmatmul.mubr.msk.bf16.vlgmr.msra.gmra.mrb[16].mxu1 %vm713_vm1, %v1224_v58 }
 0x6f9   : > { %1852 = vmatprep.mubr.msk.bf16.mxu1 %vm1985_vm2, %v1984_v3  ;;  %1849 = vmatpush3.bf16.msra.mxu1 %v1904_v36 }
 0x6fa   : > { %1850 = vmatprep.subr.bf16.mxu1 %v1984_v3  ;;  %v1743_v3 = vld [vmem:[%s677_s20] ss:$0 sm:$0xff]  ;;  %s2399_s20 = sld [smem:[#allocation6_spill]] }
 0x6fd   : > { %1851 = vmatpush3.bf16.msra.mxu1 %v1905_v37 }
 0x700   : > { %s2400_s19 = sadd.s32 4294967295, %s2399_s20  }
 0x701   : > { %p2322_p6 = scmp.eq.s32.totalorder %s2400_s19, 1 }
 0x703   : > { %p1932_p8 = pnand %p1931_p7, %p2322_p6 }
 0x705   : > { %p1933_p9 = pneg %p1932_p8 }
 0x707   : > { %p1940_p13 = pnand %p1939_p12, %p1933_p9 }
 0x7cb   : > { %v1277_v60 = vpop.f32.mrb[16].mxu1 }
 0x7cc   : > { %v1278_v61 = vadd.f32 %v1735_v59, %v1277_v60  ;;  %v1840_v63 = vpop.f32.mrb[17].mxu1 }
 0x7cd   : > { %v1280_v0 = vpop.f32.mrb[18].mxu1 }
 0x7ce   : > { %v1281_v1 = vadd.f32 %v1735_v59, %v1280_v0  ;;  %v1841_v2 = vpop.f32.mrb[19].mxu1  ;;  %v1284_v6 = vadd.f32 %v1278_v61, %v2150_v4 }
 0x7d0   : > { %v1288_v62 = vsel %vm713_vm1, %v1284_v6, 0.0  ;;  %v1285_v7 = vadd.f32 %v1281_v1, %v2152_v5  ;;  %v1903_v5 = vld [vmem:[%s2395_s2] sm:$0xff]  }
 0x7d1   : > { %1289 = vadd.xlane.f32.xlu1 %v1288_v62  ;;  %1843 = vmatpush3.bf16.msra.mxu0 %v1903_v5 }
 0x7d2   : > { %v1291_v8 = vsel %vm713_vm1, %v1285_v7, 0.0 }
 0x7d3   : > { %1292 = vadd.xlane.f32.xlu0 %v1291_v8 }
 0x85e   : > { %v1290_v9 = vpop.xlane.xlu1 %1289 }
 0x85f   : > { %v1295_v10 = vmul.f32 0.0625, %v1290_v9 }
 0x860   : > { %v1293_v11 = vpop.xlane.xlu0 %1292 }
 0x861   : > { %v1297_v13 = vsub.f32 %v1284_v6, %v1295_v10  ;;  %v1296_v14 = vmul.f32 0.0625, %v1293_v11 }
 0x863   : > { %v1298_v16 = vsub.f32 %v1285_v7, %v1296_v14  ;;  %v1299_v17 = vmul.f32 %v1297_v13, %v1297_v13  ;;  %v1747_v14 = vld [vmem:[%s680_s22] ss:$0 sm:$0xff] }
 0x865   : > { %v1301_v18 = vsel %vm713_vm1, %v1299_v17, 0.0  ;;  %v1300_v4 = vmul.f32 %v1298_v16, %v1298_v16 }
 0x866   : > { %1302 = vadd.xlane.f32.xlu0 %v1301_v18  ;;  %v1748_v18 = vld [vmem:[%s683_s23] ss:$0 sm:$0xff] }
 0x867   : > { %v1304_v19 = vsel %vm713_vm1, %v1300_v4, 0.0 }
 0x868   : > { %1305 = vadd.xlane.f32.xlu1 %v1304_v19 }
 0x8f3   : > { %v1303_v21 = vpop.xlane.xlu0 %1302 }
 0x8f4   : > { %v1307_v22 = vmul.f32 0.0625, %v1303_v21 }
 0x8f5   : > { %v1306_v23 = vpop.xlane.xlu1 %1305 }
 0x8f6   : > { %v1309_v24 = vadd.f32 1e-05, %v1307_v22  ;;  %v1308_v20 = vmul.f32 0.0625, %v1306_v23 }
 0x8f8   : > { %1922 = vrsqrt.f32 %v1309_v24  ;;  %v1310_v26 = vadd.f32 1e-05, %v1308_v20 }
 0x8fa   : > { %1924 = vrsqrt.f32 %v1310_v26 }
 0x902   : > { %v1923_v27 = vpop.eup %1922 }
 0x903   : > { %v1313_v29 = vmul.f32 %v1923_v27, %v1297_v13 }
 0x904   : > { %v1925_v30 = vpop.eup %1924 }
 0x905   : > { %v1321_v25 = vmul.f32 %v1738_v28, %v1313_v29  ;;  %v1314_v31 = vmul.f32 %v1925_v30, %v1298_v16 }
 0x907   : > { %v1322_v33 = vmul.f32 %v1738_v28, %v1314_v31  ;;  %v1329_v15 = vadd.f32 %v1739_v32, %v1321_v25 }
 0x909   : > { %v1330_v34 = vadd.f32 %v1739_v32, %v1322_v33 }
 0x90b   : > { %v1331_v35 = vpack.c.bf16 %v1330_v34, %v1329_v15 }
 0x90d   : > { %1845 = vmatmul.mubr.msk.bf16.vlgmr.msra.gmra.mrb[20].mxu0 %vm713_vm1, %v1331_v35 }
 0x9e0   : > { %v1384_v39 = vpop.f32.mrb[20].mxu0 }
 0x9e1   : > { %v1385_v40 = vadd.f32 %v1740_v38, %v1384_v39  ;;  %v1846_v41 = vpop.f32.mrb[21].mxu0 }
 0x9e2   : > { %v1387_v42 = vpop.f32.mrb[22].mxu0 }
 0x9e3   : > { %v1388_v12 = vadd.f32 %v1740_v38, %v1387_v42  ;;  %v1847_v43 = vpop.f32.mrb[23].mxu0  ;;  %v1391_v44 = vmax.f32 %v1385_v40, 0.0 }
 0x9e5   : > { %v1392_v45 = vmax.f32 %v1388_v12, 0.0 }
 0x9e7   : > { %v1393_v46 = vpack.c.bf16 %v1392_v45, %v1391_v44 }
 0x9e9   : > { %1853 = vmatmul.mubr.msk.bf16.vlgmr.msra.gmra.mrb[20].mxu1 %vm1417_vm5, %v1393_v46 }
 0xabc   : > { %v1455_v47 = vpop.f32.mrb[20].mxu1 }
 0xabd   : > { %v1456_v48 = vadd.f32 %v1743_v3, %v1455_v47  ;;  %v1854_v49 = vpop.f32.mrb[21].mxu1 }
 0xabe   : > { %v1458_v50 = vpop.f32.mrb[22].mxu1 }
 0xabf   : > { %v1459_v51 = vadd.f32 %v1743_v3, %v1458_v50  ;;  %v1855_v52 = vpop.f32.mrb[23].mxu1  ;;  %v1462_v53 = vadd.f32 %v1456_v48, %v1329_v15 }
 0xac1   : > { %v1466_v54 = vsel %vm713_vm1, %v1462_v53, 0.0  ;;  %v1463_v55 = vadd.f32 %v1459_v51, %v1330_v34 }
 0xac2   : > { %1467 = vadd.xlane.f32.xlu0 %v1466_v54 }
 0xac3   : > { %v1469_v56 = vsel %vm713_vm1, %v1463_v55, 0.0 }
 0xac4   : > { %1470 = vadd.xlane.f32.xlu1 %v1469_v56 }
 0xb4f   : > { %v1468_v57 = vpop.xlane.xlu0 %1467 }
 0xb50   : > { %v1472_v58 = vmul.f32 0.0625, %v1468_v57 }
 0xb51   : > { %v1471_v59 = vpop.xlane.xlu1 %1470 }
 0xb52   : > { %v1474_v60 = vsub.f32 %v1462_v53, %v1472_v58  ;;  %v1473_v61 = vmul.f32 0.0625, %v1471_v59 }
 0xb54   : > { %v1475_v63 = vsub.f32 %v1463_v55, %v1473_v61  ;;  %v1476_v0 = vmul.f32 %v1474_v60, %v1474_v60 }
 0xb56   : > { %v1478_v1 = vsel %vm713_vm1, %v1476_v0, 0.0  ;;  %v1477_v2 = vmul.f32 %v1475_v63, %v1475_v63 }
 0xb57   : > { %1479 = vadd.xlane.f32.xlu0 %v1478_v1 }
 0xb58   : > { %v1481_v6 = vsel %vm713_vm1, %v1477_v2, 0.0 }
 0xb59   : > { %1482 = vadd.xlane.f32.xlu1 %v1481_v6 }
 0xbe4   : > { %v1480_v62 = vpop.xlane.xlu0 %1479 }
 0xbe5   : > { %v1484_v7 = vmul.f32 0.0625, %v1480_v62 }
 0xbe6   : > { %v1483_v8 = vpop.xlane.xlu1 %1482 }
 0xbe7   : > { %v1486_v9 = vadd.f32 1e-05, %v1484_v7  ;;  %v1485_v10 = vmul.f32 0.0625, %v1483_v8 }
 0xbe9   : > { %1926 = vrsqrt.f32 %v1486_v9  ;;  %v1487_v11 = vadd.f32 1e-05, %v1485_v10 }
 0xbeb   : > { %1928 = vrsqrt.f32 %v1487_v11 }
 0xbf3   : > { %v1927_v13 = vpop.eup %1926 }
 0xbf4   : > { %v1490_v16 = vmul.f32 %v1927_v13, %v1474_v60 }
 0xbf5   : > { %v1929_v17 = vpop.eup %1928 }
 0xbf6   : > { %v1498_v4 = vmul.f32 %v1747_v14, %v1490_v16  ;;  %v1491_v19 = vmul.f32 %v1929_v17, %v1475_v63 }
 0xbf8   : > { %v1499_v5 = vmul.f32 %v1747_v14, %v1491_v19  ;;  %v1506_v21 = vadd.f32 %v1748_v18, %v1498_v4 }
 0xbfa   : > { %v1507_v22 = vadd.f32 %v1748_v18, %v1499_v5  ;;  %1508 = vst.msk [vmem:[#allocation2] sm:$0xff] %vm713_vm1, %v1506_v21 }
 0xbfc   : > { %1509 = vst.msk [vmem:[#allocation2 + $0x8] sm:$0xff] %vm713_vm1, %v1507_v22 }
 0xbfd   : > { %1943 = shalt.err (!%p1940_p13)
}
 0xbfe   : > { %s2402_s25 = sld [smem:[#allocation12_spill]] }
 0xc04   : > { %s1944_s16 = scalar_lea.hbm %s2402_s25, 256 }
 0xc05   : > { %p1945_p0 = scmp.ne.s32.totalorder %s2402_s25, %s1944_s16  ;;  %p1950_p3 = scmp.lt.u32.totalorder %s1944_s16, %s2402_s25 }
 0xc07   : > { %p1946_p1 = pnand %p1945_p0, %p2322_p6 }
 0xc09   : > { %p1947_p2 = pneg %p1946_p1 }
 0xc0b   : > { %p1952_p4 = pnand %p1950_p3, %p1947_p2 }
 0xc0d   : > { %1955 = shalt.err (!%p1952_p4)
}
 0xc0e   : > { %s1993_s20 = smov 128  }
 0xc0f   : > { %1857 = dma.vmem_to_hbm [thread:$0]  (%p2322_p6), %s1520_s27, 256, %s2402_s25, [#allocation3], %s1993_s20, %s1993_s20, %s1991_s15  }
 0xc10   : > { %1969 = dma.done.wait (%p2322_p6), [#allocation3], 256  }
 0xc11   : > { %1971 = vsyncadd (%p2322_p6), [#allocation3], 4294967040 }
 0xc12 PF: > { %s2403_s2 = sld [smem:[#allocation6_spill]]  ;;  %s2404_s29 = sld [smem:[#allocation5_spill]] }
 0xc13   : > { %s2405_s30 = sld [smem:[#allocation7_spill]] }
 0xc18   : > { %s25_s15 = sadd.s32 1, %s2403_s2  }
 0xc19   : > { %p22_p5 = scmp.ge.s32.totalorder %s25_s15, 4  }
 0xc1b   :  { %24 = sbr.rel (!%p22_p5) target bundleno = 8 (0x8), region = 147 }
 0xc22   :  { %1535 = vsyncpa [#allocation3], 1 }
 0xc23   :  { %1537 = vsyncpa [#allocation3 + $0x1], 1 }

</bundles_post_ra>
